<compile_context>
chip_gen: v7x
topology: tpu7x:2x2x1
jax: 0.10.0
libtpu: 0.0.40
codegen_flags: <defaults>
</compile_context>

<pallas_src>
import functools

import jax
import jax.numpy as jnp
from jax.experimental import pallas as pl
from jax.experimental.pallas import tpu as pltpu


# ---------------------------------------------------------------------------
# Kernel
# ---------------------------------------------------------------------------
def _rmsnorm_kernel(x_ref, w_ref, o_ref, *, eps, x_dtype, inv_dim, exact_rounding):
    # x_ref: (TM, Dp) tile, w_ref: (1, Dp) f32 weight (resident), o_ref: (TM, Dp)
    x = x_ref[...].astype(jnp.float32)                         # x.float()
    # sum/true_dim == mean over the (unpadded) normalized axis; padded lanes are 0.
    ms = jnp.sum(x * x, axis=-1, keepdims=True) * inv_dim      # mean(x^2, -1)   (XLU)
    inv = jax.lax.rsqrt(ms + eps)                              # rsqrt(. + eps)  (EUP)
    normed = x * inv
    if exact_rounding:
        # torch-exact: .type_as(x) then promote back to f32 for the weight mul.
        normed = normed.astype(x_dtype).astype(jnp.float32)
    out = normed * w_ref[...]                                  # * weight (f32)
    o_ref[...] = out.astype(o_ref.dtype)


# ---------------------------------------------------------------------------
# Generation-aware VMEM budgeting
# ---------------------------------------------------------------------------
_MiB = 1024 * 1024
_F32_TEMPS = 2  # conservative count of full-tile f32 intermediates inside the kernel


def _vmem_budgets():
    """(tile_budget_bytes, vmem_limit_bytes) derived from the chip's VMEM size."""
    try:
        cap = int(pltpu.get_tpu_info().vmem_capacity_bytes)
    except Exception:
        cap = 64 * _MiB  # conservative fallback (v7x per-TC size)
    limit = min(int(cap * 0.80), cap - 12 * _MiB)
    limit = max(limit, 32 * _MiB)
    budget = max(limit - 16 * _MiB, 16 * _MiB)
    return budget, limit


def _sublane_pack(dtype) -> int:
    """Rows per packed vreg sublane group for a dtype."""
    itemsize = jnp.dtype(dtype).itemsize
    if itemsize >= 4:
        return 8
    if itemsize == 2:
        return 16
    return 32


def _pick_block_rows(rows: int, dim_p: int, x_dtype, out_dtype, budget: int) -> int:
    pack = max(_sublane_pack(x_dtype), _sublane_pack(out_dtype))
    # Double-buffered input + output tiles, plus single-buffered f32 intermediates.
    bytes_per_row = (
        2 * dim_p * (jnp.dtype(x_dtype).itemsize + jnp.dtype(out_dtype).itemsize)
        + _F32_TEMPS * dim_p * 4
    )
    max_rows_by_vmem = max(pack, budget // bytes_per_row)
    br = max(pack, min(max_rows_by_vmem, rows))
    br = max(pack, (br // pack) * pack)  # sublane-aligned
    return br


# ---------------------------------------------------------------------------
# Wrapper
# ---------------------------------------------------------------------------
def rmsnorm(x, weight, eps: float = 1e-6, *, block_rows: int | None = None,
            out_dtype=None, exact_torch_promotion: bool = False,
            exact_rounding: bool = True):
    """Pallas RMSNorm.  x: (..., dim); weight: (dim,).

    out_dtype=None -> output dtype == x.dtype (bandwidth-optimal default).
    exact_torch_promotion=True -> output dtype = result_type(x, f32), matching
    the PyTorch module's `type_as(x) * float32-weight` promotion exactly.
    exact_rounding=False skips the f32->x.dtype->f32 round-trip (non-torch-exact).
    """
    dim = x.shape[-1]
    lead = x.shape[:-1]
    rows = 1
    for s in lead:
        rows *= s

    if out_dtype is None:
        out_dtype = jnp.result_type(x.dtype, jnp.float32) if exact_torch_promotion \
            else x.dtype

    # Lane-dense padding of the normalized axis to a multiple of 128.
    dim_p = max(128, ((dim + 127) // 128) * 128)

    x2d = x.reshape(rows, dim)
    w2d = weight.reshape(1, dim).astype(jnp.float32)
    if dim_p != dim:
        x2d = jnp.pad(x2d, ((0, 0), (0, dim_p - dim)))
        w2d = jnp.pad(w2d, ((0, 0), (0, dim_p - dim)))

    budget, vmem_limit = _vmem_budgets()
    if block_rows is None:
        block_rows = _pick_block_rows(rows, dim_p, x.dtype, out_dtype, budget)

    grid = (pl.cdiv(rows, block_rows),)  # tail block masked by Pallas

    kernel = functools.partial(
        _rmsnorm_kernel,
        eps=eps,
        x_dtype=x.dtype,
        inv_dim=1.0 / float(dim),
        exact_rounding=exact_rounding,
    )

    out2d = pl.pallas_call(
        kernel,
        out_shape=jax.ShapeDtypeStruct((rows, dim_p), out_dtype),
        grid_spec=pltpu.PrefetchScalarGridSpec(
            num_scalar_prefetch=0,
            grid=grid,
            in_specs=[
                pl.BlockSpec((block_rows, dim_p), lambda i: (i, 0)),
                pl.BlockSpec((1, dim_p), lambda i: (0, 0)),   # weight stays resident
            ],
            out_specs=pl.BlockSpec((block_rows, dim_p), lambda i: (i, 0)),
        ),
        compiler_params=pltpu.CompilerParams(
            dimension_semantics=("parallel",),    # shards rows across TCs (v7x)
            vmem_limit_bytes=vmem_limit,          # generation-aware scoped limit
        ),
    )(x2d, w2d)

    if dim_p != dim:
        out2d = out2d[:, :dim]
    return out2d.reshape(*lead, dim)


# ---------------------------------------------------------------------------
# Pure-JAX reference (mirrors the PyTorch forward, torch promotion)
# ---------------------------------------------------------------------------
def rmsnorm_ref(x, weight, eps: float = 1e-6):
    xf = x.astype(jnp.float32)
    inv = jax.lax.rsqrt(jnp.mean(xf * xf, axis=-1, keepdims=True) + eps)
    return (xf * inv).astype(x.dtype).astype(jnp.float32) * weight.astype(jnp.float32)


if __name__ == "__main__":
    key = jax.random.PRNGKey(0)
    batch, seq, dim = 2, 8, 128          # lane-dense last dim (multiple of 128)
    x = jax.random.normal(key, (batch, seq, dim), dtype=jnp.float32)
    # Deterministic parameter init, matching nn.Parameter(torch.ones(dim)).
    weight = jnp.ones((dim,), dtype=jnp.float32)

    # f32 path (default out_dtype == input dtype == torch-promoted dtype here).
    out = jax.block_until_ready(rmsnorm(x, weight, eps=1e-6))
    ref = rmsnorm_ref(x, weight, eps=1e-6)
    assert out.shape == x.shape
    assert out.dtype == ref.dtype
    assert jnp.allclose(out, ref, atol=1e-5, rtol=1e-5), "mismatch vs reference (f32)"

    # bf16 path: default bandwidth-optimal bf16 writeback.
    xb = x.astype(jnp.bfloat16)
    outb = jax.block_until_ready(rmsnorm(xb, weight, eps=1e-6))
    assert outb.dtype == jnp.bfloat16
    refb = rmsnorm_ref(xb, weight, eps=1e-6)
    assert jnp.allclose(outb.astype(jnp.float32), refb.astype(jnp.bfloat16).astype(jnp.float32),
                        atol=2e-2, rtol=2e-2), "mismatch vs reference (bf16)"

    # bf16 path with exact torch promotion (f32 output).
    outb_f32 = jax.block_until_ready(rmsnorm(xb, weight, eps=1e-6,
                                             exact_torch_promotion=True))
    assert outb_f32.dtype == jnp.float32
    assert jnp.allclose(outb_f32, refb, atol=1e-5, rtol=1e-5), \
        "mismatch vs reference (bf16, torch promotion)"

    # Non-divisible rows count and non-multiple-of-128 dim (padded lane-dense path).
    dim2 = 96
    x_odd = jax.random.normal(jax.random.PRNGKey(1), (3, 5, dim2), dtype=jnp.float32)
    w2 = jnp.ones((dim2,), dtype=jnp.float32)
    out_odd = jax.block_until_ready(rmsnorm(x_odd, w2, eps=1e-6))
    assert jnp.allclose(out_odd, rmsnorm_ref(x_odd, w2, eps=1e-6),
                        atol=1e-5, rtol=1e-5), "mismatch vs reference (odd rows/dim)"

    print("KERNEL_OK")
</pallas_src>

<mosaic_0001>
module attributes {stable_mosaic.version = 11 : i64} {
  func.func @_rmsnorm_kernel(%arg0: i32, %arg1: memref<16x128xf32, #tpu.memory_space<vmem>>, %arg2: memref<1x128xf32, #tpu.memory_space<vmem>>, %arg3: memref<16x128xf32, #tpu.memory_space<vmem>>) attributes {dimension_semantics = [#tpu.dimension_semantics<parallel>], iteration_bounds = array<i64: 1>, scalar_prefetch = 0 : i64, scratch_operands = 0 : i64, tpu.core_type = #tpu.core_type<tc>, window_params = [{transform_indices = @transform_0, window_bounds = array<i64: 16, 128>}, {pipeline_mode = #tpu.pipeline_mode<synchronous>, transform_indices = @transform_1, window_bounds = array<i64: 1, 128>}, {transform_indices = @transform_2, window_bounds = array<i64: 16, 128>}]} {
    %c0 = arith.constant 0 : index
    %c0_0 = arith.constant 0 : index
    %0 = vector.load %arg1[%c0, %c0_0] : memref<16x128xf32, #tpu.memory_space<vmem>>, vector<16x128xf32>
    %1 = arith.mulf %0, %0 : vector<16x128xf32>
    %cst = arith.constant dense<0.000000e+00> : vector<16xf32>
    %2 = vector.multi_reduction <add>, %1, %cst [1] : vector<16x128xf32> to vector<16xf32>
    %3 = vector.shape_cast %2 : vector<16xf32> to vector<16x1xf32>
    %cst_1 = arith.constant 7.812500e-03 : f32
    %4 = vector.broadcast %cst_1 : f32 to vector<16x1xf32>
    %5 = arith.mulf %3, %4 : vector<16x1xf32>
    %cst_2 = arith.constant 9.99999997E-7 : f32
    %6 = vector.broadcast %cst_2 : f32 to vector<16x1xf32>
    %7 = arith.addf %5, %6 : vector<16x1xf32>
    %8 = math.rsqrt %7 : vector<16x1xf32>
    %9 = vector.broadcast %8 : vector<16x1xf32> to vector<16x128xf32>
    %10 = arith.mulf %0, %9 : vector<16x128xf32>
    %c0_3 = arith.constant 0 : index
    %c0_4 = arith.constant 0 : index
    %11 = vector.load %arg2[%c0_3, %c0_4] : memref<1x128xf32, #tpu.memory_space<vmem>>, vector<1x128xf32>
    %12 = vector.broadcast %11 : vector<1x128xf32> to vector<16x128xf32>
    %13 = arith.mulf %10, %12 : vector<16x128xf32>
    %c0_5 = arith.constant 0 : index
    %c0_6 = arith.constant 0 : index
    %14 = vector.load %arg3[%c0_5, %c0_6] : memref<16x128xf32, #tpu.memory_space<vmem>>, vector<16x128xf32>
    tpu.vector_store %arg3[%c0_5, %c0_6], %13 {strides = array<i32>} : memref<16x128xf32, #tpu.memory_space<vmem>>, vector<16x128xf32>,
    return
  }
  func.func @transform_0(%arg0: i32) -> (i32, i32) {
    %c0_i32 = arith.constant 0 : i32
    %c0_i32_0 = arith.constant 0 : i32
    return %arg0, %c0_i32 : i32, i32
  }
  func.func @transform_1(%arg0: i32) -> (i32, i32) {
    %c0_i32 = arith.constant 0 : i32
    %c0_i32_0 = arith.constant 0 : i32
    %c0_i32_1 = arith.constant 0 : i32
    return %c0_i32, %c0_i32_0 : i32, i32
  }
  func.func @transform_2(%arg0: i32) -> (i32, i32) {
    %c0_i32 = arith.constant 0 : i32
    %c0_i32_0 = arith.constant 0 : i32
    return %arg0, %c0_i32 : i32, i32
  }
}

</mosaic_0001>

<bundles_post_ra>
// kernel: tpu_custom_call.1
= control target key start
LH: loop header
LB: loop body
LE: loop exit
PB: predicated region body
PF: predicated region fallthrough
CT: control target
= control target key end

     0   :  { %7 = vsyncpa [#allocation3], 0  ;;  %s179_s0 = inlined_call_operand.hbm [shape: f32[16,128], index: 0, kind: input, shape index: {}]   ;;  %s180_s1 = inlined_call_operand.vmem [shape: f32[1,128], index: 1, kind: input, shape index: {}]   ;;  %s181_s2 = inlined_call_operand.hbm [shape: f32[16,128], index: 2, kind: output, shape index: {}]  }
   0x1   :  { %8 = vsyncpa [#allocation4], 0  ;;  %s127_s9 = smov [#allocation2]   ;;  %s79_s13 = scalar_lea.hbm %s179_s0, 256 }
   0x2   :  { %s14_s10 = sshll.u32 %s127_s9, 4  ;;  %p80_p0 = scmp.ne.s32.totalorder %s179_s0, %s79_s13  ;;  %s15_s10 = int_to_ptr.vmem [resolvable:$true] %s14_s10 }
   0x3   :  { %p83_p1 = scmp.lt.u32.totalorder %s79_s13, %s179_s0 }
   0x5   :  { %p85_p2 = pnand %p83_p1, %p80_p0 }
   0x7   :  { %88 = shalt.err (!%p85_p2)
}
   0x8   :  { %s89_s18 = scalar_lea.vmem %s15_s10, 256  ;;  %p94_p4 = scmp.lt.s32.totalorder %s15_s10, %s15_s10 }
   0x9   :  { %p90_p3 = scmp.ne.s32.totalorder %s15_s10, %s89_s18  ;;  %p95_p5 = scmp.lt.s32.totalorder %s89_s18, %s89_s18 }
   0xb   :  { %p96_p6 = por %p95_p5, %p94_p4 }
   0xd   :  { %p97_p7 = pnand %p96_p6, %p90_p3 }
   0xf   :  { %100 = shalt.err (!%p97_p7)
}
  0x10   :  { %s128_s19 = smov 128   ;;  %s129_s20 = smov 8  }
  0x11   :  { %20 = dma.hbm_to_vmem [thread:$0]  %s179_s0, 256, %s15_s10, [#allocation3], %s128_s19, %s128_s19, %s129_s20  }
  0x12   :  { %123 = dma.done.wait [#allocation3], 256  }
  0x13   :  { %124 = vsyncadd [#allocation3], 4294967040  ;;  %v26_v0 = vld [vmem:[#allocation2] sm:$0xff]  ;;  %v27_v1 = vld [vmem:[#allocation2 + $0x8] sm:$0xff]  ;;  %s130_s0 = smov [#allocation5]  }
  0x14   :  { %v28_v2 = vmul.f32 %v26_v0, %v26_v0  ;;  %v29_v3 = vmul.f32 %v27_v1, %v27_v1  ;;  %v70_v11 = vld [vmem:[%s180_s1] ss:$0 sm:$0xff]  ;;  %s58_s25 = sshll.u32 %s130_s0, 4  ;;  %s59_s25 = int_to_ptr.vmem [resolvable:$true] %s58_s25 }
  0x15   :  { %s101_s26 = scalar_lea.vmem %s59_s25, 256  ;;  %p106_p9 = scmp.lt.s32.totalorder %s59_s25, %s59_s25 }
  0x16   :  { %30 = vadd.xlane.f32.xlu0 %v28_v2  ;;  %p102_p8 = scmp.ne.s32.totalorder %s59_s25, %s101_s26  ;;  %p107_p10 = scmp.lt.s32.totalorder %s101_s26, %s101_s26 }
  0x18   :  { %p108_p11 = por %p107_p10, %p106_p9 }
  0x1a   :  { %32 = vadd.xlane.f32.xlu0 %v29_v3  ;;  %p109_p12 = pnand %p108_p11, %p102_p8 }
  0xa3   :  { %v31_v4 = vpop.xlane.xlu0 %30 }
  0xa4   :  { %v34_v5 = vmul.f32 0.0078125, %v31_v4 }
  0xa6   :  { %v36_v6 = vadd.f32 1e-06, %v34_v5 }
  0xa7   :  { %v33_v7 = vpop.xlane.xlu0 %32 }
  0xa8   :  { %75 = vrsqrt.f32 %v36_v6  ;;  %v35_v8 = vmul.f32 0.0078125, %v33_v7 }
  0xaa   :  { %v37_v9 = vadd.f32 1e-06, %v35_v8 }
  0xac   :  { %77 = vrsqrt.f32 %v37_v9 }
  0xb2   :  { %v76_v10 = vpop.eup %75 }
  0xb3   :  { %v40_v12 = vmul.f32 %v76_v10, %v26_v0 }
  0xb5   :  { %v49_v13 = vmul.f32 %v70_v11, %v40_v12 }
  0xb6   :  { %v78_v14 = vpop.eup %77 }
  0xb7   :  { %v41_v15 = vmul.f32 %v78_v14, %v27_v1  ;;  %51 = vst [vmem:[#allocation5] sm:$0xff] %v49_v13 }
  0xb9   :  { %v50_v16 = vmul.f32 %v70_v11, %v41_v15 }
  0xbb   :  { %52 = vst [vmem:[#allocation5 + $0x8] sm:$0xff] %v50_v16 }
  0xbc   :  { %112 = shalt.err (!%p109_p12)
}
  0xbd   :  { %s113_s1 = scalar_lea.hbm %s181_s2, 256 }
  0xbe   :  { %p114_p13 = scmp.ne.s32.totalorder %s181_s2, %s113_s1  ;;  %p117_p0 = scmp.lt.u32.totalorder %s113_s1, %s181_s2 }
  0xc0   :  { %p119_p1 = pnand %p117_p0, %p114_p13 }
  0xc2   :  { %122 = shalt.err (!%p119_p1)
}
  0xc3   :  { %64 = dma.vmem_to_hbm [thread:$0]  %s59_s25, 256, %s181_s2, [#allocation4], %s128_s19, %s128_s19, %s129_s20  }
  0xc4   :  { %125 = dma.done.wait [#allocation4], 256  }
  0xc5   :  { %126 = vsyncadd [#allocation4], 4294967040 }
  0xc6   :  { %68 = vsyncpa [#allocation3], 1 }
  0xc7   :  { %69 = vsyncpa [#allocation4], 1 }

</bundles_post_ra>
